<compile_context>
chip_gen: v5e
topology: v5e:2x2
jax: 0.10.0
libtpu: 0.0.40
codegen_flags: <defaults>
</compile_context>

<pallas_src>
import functools

import jax
import jax.numpy as jnp
from jax import lax
from jax.experimental import pallas as pl
from jax.experimental.pallas import tpu as pltpu

_LANE = 128
_SUB = 8
# 8192 rows -> 4 MiB per f32 input block (2 MiB for bf16).  Kept at 8192 rows
# for all dtypes so the f32 intermediates (diff, square) stay <= 4 MiB each.
_MAX_TILE_ROWS = 8192
# v7x has 2 TensorCores per chip; on 1-TC chips the split axis is a cheap
# serial loop over 2 output blocks.
_NUM_SPLITS = 2
# Raised scoped-VMEM budget: ~32 MiB worst-case actual usage; 48 MiB is under
# v7x's 64 MiB physical VMEM per core and far under v5e/v6e's 128 MiB.
_VMEM_LIMIT_BYTES = 48 * 1024 * 1024


def _round_up(x, m):
    return ((x + m - 1) // m) * m


def _rmse_partial_kernel(yhat_ref, y_ref, out_ref, *,
                         n_rows, tile_rows, steps_per_split):
    s = pl.program_id(0)   # split (TensorCore) axis -- "parallel"
    i = pl.program_id(1)   # streaming / reduction axis -- "arbitrary"

    @pl.when(i == 0)
    def _():
        out_ref[...] = jnp.zeros_like(out_ref)

    # Cast to f32 inside the kernel; HBM traffic stays at the native dtype.
    d = yhat_ref[...].astype(jnp.float32) - y_ref[...].astype(jnp.float32)
    sq = d * d

    blk = s * steps_per_split + i               # logical row-block index
    block_start = blk * tile_rows
    # True only for the single block that overhangs the (n_rows, 128) slab and
    # for the (at most one) filler step when n_blocks is odd.
    ragged = block_start + tile_rows > n_rows

    @pl.when(jnp.logical_not(ragged))
    def _():
        # Hot path: fold (tile_rows, 128) -> (8, 128) with plain VPU adds into
        # the VMEM-resident output block.  No mask ops per step.
        out_ref[...] += jnp.sum(
            sq.reshape(tile_rows // _SUB, _SUB, _LANE), axis=0)

    @pl.when(ragged)
    def _():
        # Cold path (runs at most once per split): rows past n_rows hold
        # unspecified VMEM data, so zero their contribution.  (t,1) iota; the
        # where broadcasts it across lanes.
        row_ids = block_start + lax.broadcasted_iota(
            jnp.int32, (tile_rows, 1), 0)
        msq = jnp.where(row_ids < n_rows, sq, 0.0)
        out_ref[...] += jnp.sum(
            msq.reshape(tile_rows // _SUB, _SUB, _LANE), axis=0)


def rmse_loss(yhat, y, eps=1e-6):
    assert yhat.shape == y.shape, "yhat and y must have the same shape"
    n_elems = yhat.size

    # Flatten to a lane-dense (rows, 128) slab; reshape of a contiguous array
    # is free.  Pad (a real copy) only in the rare numel % 128 != 0 case.
    flat_yhat = jnp.ravel(yhat)
    flat_y = jnp.ravel(y)
    n128 = _round_up(n_elems, _LANE)
    if n128 != n_elems:
        flat_yhat = jnp.pad(flat_yhat, (0, n128 - n_elems))
        flat_y = jnp.pad(flat_y, (0, n128 - n_elems))
    rows = n128 // _LANE
    yhat2d = flat_yhat.reshape(rows, _LANE)
    y2d = flat_y.reshape(rows, _LANE)

    tile_rows = min(_MAX_TILE_ROWS, _round_up(rows, _SUB))
    n_blocks = pl.cdiv(rows, tile_rows)
    steps = pl.cdiv(n_blocks, _NUM_SPLITS)
    grid = (_NUM_SPLITS, steps)
    last_block = n_blocks - 1

    def in_map(s, i):
        # Clamp the (at most one) filler step onto the last real block; the
        # kernel's row mask zeroes its contribution, so no double counting and
        # no out-of-range DMA.
        return (jnp.minimum(s * steps + i, last_block), 0)

    kernel = functools.partial(
        _rmse_partial_kernel, n_rows=rows, tile_rows=tile_rows,
        steps_per_split=steps)

    bytes_in = 2 * n_elems * yhat.dtype.itemsize
    partials = pl.pallas_call(
        kernel,
        out_shape=jax.ShapeDtypeStruct((_NUM_SPLITS * _SUB, _LANE),
                                       jnp.float32),
        grid_spec=pltpu.PrefetchScalarGridSpec(
            num_scalar_prefetch=0,
            grid=grid,
            in_specs=[
                pl.BlockSpec((tile_rows, _LANE), in_map),
                pl.BlockSpec((tile_rows, _LANE), in_map),
            ],
            # Per-split (8, 128) partial-sum block; index depends only on the
            # parallel axis, so each core owns its own accumulator (no race).
            out_specs=pl.BlockSpec((_SUB, _LANE), lambda s, i: (s, 0)),
        ),
        compiler_params=pltpu.CompilerParams(
            dimension_semantics=("parallel", "arbitrary"),
            vmem_limit_bytes=_VMEM_LIMIT_BYTES,
        ),
        cost_estimate=pl.CostEstimate(
            flops=3 * n_elems, transcendentals=0,
            bytes_accessed=bytes_in + _NUM_SPLITS * _SUB * _LANE * 4),
    )(yhat2d, y2d)

    # Tiny finalize in the wrapper: sum the 2x(8,128) partials, mean over the
    # TRUE element count, sqrt(mse + eps).
    sum_sq = jnp.sum(partials)
    mse = sum_sq / jnp.float32(n_elems)
    return jnp.sqrt(mse + jnp.float32(eps))


if __name__ == "__main__":
    key = jax.random.PRNGKey(0)
    k1, k2 = jax.random.split(key)
    shape = (2, 4, 16, 16)  # NCHW-like predictions / targets
    yhat = jax.random.normal(k1, shape, dtype=jnp.float32)
    y = jax.random.normal(k2, shape, dtype=jnp.float32)

    loss = rmse_loss(yhat, y)
    jax.block_until_ready(loss)

    # Reference check in plain JAX.
    ref = jnp.sqrt(jnp.mean((yhat - y) ** 2) + 1e-6)
    assert jnp.allclose(loss, ref, rtol=1e-5, atol=1e-6), (loss, ref)

    print("KERNEL_OK")
</pallas_src>

<mosaic_0001>
module attributes {stable_mosaic.version = 11 : i64} {
  func.func @_rmse_partial_kernel(%arg0: i32, %arg1: i32, %arg2: memref<16x128xf32, #tpu.memory_space<vmem>>, %arg3: memref<16x128xf32, #tpu.memory_space<vmem>>, %arg4: memref<8x128xf32, #tpu.memory_space<vmem>>) attributes {dimension_semantics = [#tpu.dimension_semantics<parallel>, #tpu.dimension_semantics<arbitrary>], iteration_bounds = array<i64: 2, 1>, scalar_prefetch = 0 : i64, scratch_operands = 0 : i64, tpu.core_type = #tpu.core_type<tc>, window_params = [{transform_indices = @transform_0, window_bounds = array<i64: 16, 128>}, {transform_indices = @transform_1, window_bounds = array<i64: 16, 128>}, {transform_indices = @transform_2, window_bounds = array<i64: 8, 128>}]} {
    %c0_i32 = arith.constant 0 : i32
    %0 = arith.cmpi eq, %arg1, %c0_i32 : i32
    %1 = arith.extui %0 : i1 to i32
    %c0_i32_0 = arith.constant 0 : i32
    %2 = arith.cmpi ne, %1, %c0_i32_0 : i32
    scf.if %2 {
      %cst = arith.constant 0.000000e+00 : f32
      %17 = vector.broadcast %cst : f32 to vector<8x128xf32>
      %c0_8 = arith.constant 0 : index
      %c0_9 = arith.constant 0 : index
      %18 = vector.load %arg4[%c0_8, %c0_9] : memref<8x128xf32, #tpu.memory_space<vmem>>, vector<8x128xf32>
      tpu.vector_store %arg4[%c0_8, %c0_9], %17 {strides = array<i32>} : memref<8x128xf32, #tpu.memory_space<vmem>>, vector<8x128xf32>,
    } else {
    }
    %c0 = arith.constant 0 : index
    %c0_1 = arith.constant 0 : index
    %3 = vector.load %arg2[%c0, %c0_1] : memref<16x128xf32, #tpu.memory_space<vmem>>, vector<16x128xf32>
    %c0_2 = arith.constant 0 : index
    %c0_3 = arith.constant 0 : index
    %4 = vector.load %arg3[%c0_2, %c0_3] : memref<16x128xf32, #tpu.memory_space<vmem>>, vector<16x128xf32>
    %5 = arith.subf %3, %4 : vector<16x128xf32>
    %6 = arith.mulf %5, %5 : vector<16x128xf32>
    %c1_i32 = arith.constant 1 : i32
    %7 = arith.muli %arg0, %c1_i32 : i32
    %8 = arith.addi %7, %arg1 : i32
    %c16_i32 = arith.constant 16 : i32
    %9 = arith.muli %8, %c16_i32 : i32
    %c16_i32_4 = arith.constant 16 : i32
    %10 = arith.addi %9, %c16_i32_4 : i32
    %c16_i32_5 = arith.constant 16 : i32
    %11 = arith.cmpi sgt, %10, %c16_i32_5 : i32
    %true = arith.constant true
    %12 = arith.xori %11, %true : i1
    %13 = arith.extui %12 : i1 to i32
    %c0_i32_6 = arith.constant 0 : i32
    %14 = arith.cmpi ne, %13, %c0_i32_6 : i32
    scf.if %14 {
      %c0_8 = arith.constant 0 : index
      %c0_9 = arith.constant 0 : index
      %17 = vector.load %arg4[%c0_8, %c0_9] : memref<8x128xf32, #tpu.memory_space<vmem>>, vector<8x128xf32>
      %18 = vector.shape_cast %6 : vector<16x128xf32> to vector<2x8x128xf32>
      %cst = arith.constant dense<0.000000e+00> : vector<8x128xf32>
      %19 = vector.multi_reduction <add>, %18, %cst [0] : vector<2x8x128xf32> to vector<8x128xf32>
      %20 = arith.addf %17, %19 : vector<8x128xf32>
      %c0_10 = arith.constant 0 : index
      %c0_11 = arith.constant 0 : index
      %21 = vector.load %arg4[%c0_10, %c0_11] : memref<8x128xf32, #tpu.memory_space<vmem>>, vector<8x128xf32>
      tpu.vector_store %arg4[%c0_10, %c0_11], %20 {strides = array<i32>} : memref<8x128xf32, #tpu.memory_space<vmem>>, vector<8x128xf32>,
    } else {
    }
    %15 = arith.extui %11 : i1 to i32
    %c0_i32_7 = arith.constant 0 : i32
    %16 = arith.cmpi ne, %15, %c0_i32_7 : i32
    scf.if %16 {
      %17 = tpu.iota {dimensions = array<i32: 0>} : vector<16x1xi32>
      %18 = vector.broadcast %9 : i32 to vector<16x1xi32>
      %19 = arith.addi %18, %17 : vector<16x1xi32>
      %c16_i32_8 = arith.constant 16 : i32
      %20 = vector.broadcast %c16_i32_8 : i32 to vector<16x1xi32>
      %21 = arith.cmpi slt, %19, %20 : vector<16x1xi32>
      %cst = arith.constant 0.000000e+00 : f32
      %22 = vector.shape_cast %21 : vector<16x1xi1> to vector<16x1xi1>
      %23 = vector.broadcast %22 : vector<16x1xi1> to vector<16x128xi1>
      %24 = vector.broadcast %cst : f32 to vector<16x128xf32>
      %25 = arith.select %23, %6, %24 : vector<16x128xi1>, vector<16x128xf32>
      %c0_9 = arith.constant 0 : index
      %c0_10 = arith.constant 0 : index
      %26 = vector.load %arg4[%c0_9, %c0_10] : memref<8x128xf32, #tpu.memory_space<vmem>>, vector<8x128xf32>
      %27 = vector.shape_cast %25 : vector<16x128xf32> to vector<2x8x128xf32>
      %cst_11 = arith.constant dense<0.000000e+00> : vector<8x128xf32>
      %28 = vector.multi_reduction <add>, %27, %cst_11 [0] : vector<2x8x128xf32> to vector<8x128xf32>
      %29 = arith.addf %26, %28 : vector<8x128xf32>
      %c0_12 = arith.constant 0 : index
      %c0_13 = arith.constant 0 : index
      %30 = vector.load %arg4[%c0_12, %c0_13] : memref<8x128xf32, #tpu.memory_space<vmem>>, vector<8x128xf32>
      tpu.vector_store %arg4[%c0_12, %c0_13], %29 {strides = array<i32>} : memref<8x128xf32, #tpu.memory_space<vmem>>, vector<8x128xf32>,
    } else {
    }
    return
  }
  func.func @transform_0(%arg0: i32, %arg1: i32) -> (i32, i32) {
    %c1_i32 = arith.constant 1 : i32
    %0 = arith.muli %arg0, %c1_i32 : i32
    %1 = arith.addi %0, %arg1 : i32
    %c0_i32 = arith.constant 0 : i32
    %2 = arith.minsi %1, %c0_i32 : i32
    %c0_i32_0 = arith.constant 0 : i32
    %c0_i32_1 = arith.constant 0 : i32
    return %2, %c0_i32_0 : i32, i32
  }
  func.func @transform_1(%arg0: i32, %arg1: i32) -> (i32, i32) {
    %c1_i32 = arith.constant 1 : i32
    %0 = arith.muli %arg0, %c1_i32 : i32
    %1 = arith.addi %0, %arg1 : i32
    %c0_i32 = arith.constant 0 : i32
    %2 = arith.minsi %1, %c0_i32 : i32
    %c0_i32_0 = arith.constant 0 : i32
    %c0_i32_1 = arith.constant 0 : i32
    return %2, %c0_i32_0 : i32, i32
  }
  func.func @transform_2(%arg0: i32, %arg1: i32) -> (i32, i32) {
    %c0_i32 = arith.constant 0 : i32
    %c0_i32_0 = arith.constant 0 : i32
    return %arg0, %c0_i32 : i32, i32
  }
}

</mosaic_0001>

<bundles_post_ra>
// kernel: tpu_custom_call.1
= control target key start
LH: loop header
LB: loop body
LE: loop exit
PB: predicated region body
PF: predicated region fallthrough
CT: control target
= control target key end

     0   :  { %7 = vsyncpa [#allocation3], 0  ;;  %s894_s0 = inlined_call_operand.hbm [shape: f32[16,128], index: 0, kind: input, shape index: {}]   ;;  %s895_s1 = inlined_call_operand.hbm [shape: f32[16,128], index: 1, kind: input, shape index: {}]   ;;  %s896_s2 = inlined_call_operand.hbm [shape: f32[16,128], index: 2, kind: output, shape index: {}]  }
   0x1   :  { %9 = vsyncpa [#allocation3 + $0x1], 0 }
   0x2   :  { %10 = vsyncpa [#allocation6], 0 }
   0x3   :  { %12 = vsyncpa [#allocation6 + $0x1], 0 }
   0x4   :  { %13 = vsyncpa [#allocation4], 0 }
   0x5   :  { %15 = vsyncpa [#allocation4 + $0x1], 0  ;;  %s713_s9 = smov 0   ;;  %s715_s10 = smov 0  }
   0x6   :  { %s717_s11 = smov 0   ;;  %s719_s12 = smov 0  }
   0x7   :  { %s721_s13 = smov 0   ;;  %s723_s14 = smov 0  }
   0x8   :  { %s725_s15 = smov 0   ;;  %s727_s16 = smov 0  }
   0x9 LB: > { %s407_s17 = sadd.s32 4294967295, %s691_s16   ;;  %s408_s18 = sadd.s32 4294967294, %s691_s16   ;;  %s691_s16 = sphi %s727_s16, %s21_s16   ;;  %s687_s15 = sphi %s725_s15, %s908_s15   ;;  %s683_s14 = sphi %s723_s14, %s907_s14   ;;  %s679_s13 = sphi %s721_s13, %s884_s13   ;;  %s675_s12 = sphi %s719_s12, %s906_s12   ;;  %s671_s11 = sphi %s717_s11, %s905_s11   ;;  %s667_s10 = sphi %s715_s10, %s904_s10   ;;  %s663_s9 = sphi %s713_s9, %s903_s9  }
   0xa   : > { %s33_s19 = sadd.s32 1, %s687_s15  ;;  %p660_p1 = scmp.ne.s32.totalorder %s679_s13, 0 }
   0xb   : > { %p35_p0 = scmp.ge.s32.totalorder %s33_s19, 2  ;;  %p54_p2 = scmp.eq.s32.totalorder %s691_s16, 0 }
   0xc   : > { %p59_p3 = scmp.ne.s32.totalorder %s679_s13, %s675_s12  ;;  %p60_p5 = scmp.eq.s32.totalorder %s407_s17, 0 }
   0xd   : > { %s910_s19 = smov (%p35_p0, %s33_s19), 0  ;;  %p759_p4 = por %p660_p1, %p54_p2 }
   0xe   : > { %p763_p6 = por %p60_p5, %p59_p3  ;;  %s101_s22 = ssub.s32 %s687_s15, %s910_s19 }
   0xf   : > { %p102_p7 = scmp.eq.s32.totalorder %s101_s22, 0  ;;  %s104_s23 = sadd.s32 1, %s671_s11 }
  0x10   : > { %p114_p8 = scmp.ne.s32.totalorder %s671_s11, %s667_s10  ;;  %p115_p9 = scmp.eq.s32.totalorder %s407_s17, 1 }
  0x11   : > { %s771_s24 = scalar_select %p102_p7, %s671_s11, %s104_s23  }
  0x12   : > { %p120_p10 = scmp.ne.s32.totalorder %s667_s10, %s663_s9  ;;  %p121_p11 = scmp.eq.s32.totalorder %s408_s18, 1 }
  0x13   : > { %p777_p12 = por %p115_p9, %p114_p8  ;;  %p410_p13 = scmp.ge.s32.totalorder %s691_s16, 2 }
  0x14   : > { %p782_p0 = por %p121_p11, %p120_p10  ;;  %p447_p1 = scmp.lt.s32.totalorder %s691_s16, 2 }
  0x15   : > { %s154_s29 = sshll.u32 %s894_s0, 4  ;;  %s693_s30 = smov [#allocation2]   ;;  %s155_s29 = int_to_ptr.hbm [resolvable:$true] %s154_s29 }
  0x16   : > { %s156_s3 = sshll.u32 %s693_s30, 4  ;;  %p792_p2 = pnand %p447_p1, %p759_p4  ;;  %s157_s3 = int_to_ptr.vmem [resolvable:$true] %s156_s3 }
  0x17   : > { %p417_p3 = scmp.ge.s32.totalorder %s691_s16, 1  ;;  %p189_p5 = scmp.lt.s32.totalorder %s691_s16, 3 }
  0x18   : > { %s524_s5 = sshra.s32 %s155_s29, 4  ;;  %p528_p8 = pneg %p792_p2  ;;  %s525_s5 = int_to_ptr.hbm [resolvable:$true] %s524_s5 }
  0x19   : > { %s526_s6 = scalar_lea.hbm %s525_s5, 16  ;;  %s531_s12 = scalar_lea.hbm %s894_s0, 16 }
  0x1a   : > { %p527_p7 = scmp.ne.s32.totalorder %s525_s5, %s526_s6  ;;  %p533_p4 = scmp.lt.s32.totalorder %s531_s12, %s526_s6 }
  0x1c   : > { %p529_p9 = pnand %p528_p8, %p527_p7 }
  0x1e   : > { %p530_p10 = pneg %p529_p9 }
  0x20   : > { %p535_p11 = pnand %p533_p4, %p530_p10 }
  0x22   : > { %538 = shalt.err (!%p535_p11)
}
  0x23   : > { %s694_s17 = smov 128   ;;  %s695_s18 = smov 8  }
  0x24   : > { %439 = dma.hbm_to_vmem [thread:$0]  (!%p792_p2), %s155_s29, 256, %s157_s3, [#allocation3], %s694_s17, %s694_s17, %s695_s18  }
  0x25   : > { %p812_p1 = pnand %p417_p3, %p189_p5  ;;  %s179_s27 = sshll.u32 %s895_s1, 4  ;;  %s180_s27 = int_to_ptr.hbm [resolvable:$true] %s179_s27 }
  0x26   : > { %s696_s28 = smov [#allocation5]   ;;  %s554_s5 = sshra.s32 %s180_s27, 4  ;;  %s555_s5 = int_to_ptr.hbm [resolvable:$true] %s554_s5 }
  0x27   : > { %s181_s30 = sshll.u32 %s696_s28, 4  ;;  %s556_s6 = scalar_lea.hbm %s555_s5, 16  ;;  %s182_s30 = int_to_ptr.vmem [resolvable:$true] %s181_s30 }
  0x28   : > { %p557_p7 = scmp.ne.s32.totalorder %s555_s5, %s556_s6  ;;  %s561_s7 = scalar_lea.hbm %s895_s1, 16 }
  0x29   : > { %p563_p3 = scmp.lt.s32.totalorder %s561_s7, %s556_s6 }
  0x2a   : > { %p559_p9 = pnand %p557_p7, %p528_p8 }
  0x2c   : > { %p560_p10 = pneg %p559_p9 }
  0x2e   : > { %p565_p5 = pnand %p563_p3, %p560_p10 }
  0x30   : > { %568 = shalt.err (!%p565_p5)
}
  0x31   : > { %442 = dma.hbm_to_vmem [thread:$0]  (!%p792_p2), %s180_s27, 256, %s182_s30, [#allocation6], %s694_s17, %s694_s17, %s695_s18  }
  0x32   : > { %193 = sbr.rel (%p812_p1) target bundleno = 109 (0x6d), region = 28  ;;  %s195_s8 = sand.u32 (!%p812_p1), 1, %s679_s13  }
  0x33   : > { %s418_s12 = sshll.u32 (!%p812_p1), %s195_s8, 4  ;;  %s196_s22 = scalar_lea.sflag (!%p812_p1), [#allocation3], %s195_s8 }
  0x34   : > { %s199_s23 = scalar_lea.vmem (!%p812_p1), [#allocation2], %s418_s12 }
  0x37   : > { %649 = dma.done.wait (%p763_p6), %s196_s22, 256  }
  0x38   : > { %651 = vsyncadd (%p763_p6), %s196_s22, 4294967040  ;;  %s206_s28 = scalar_lea.sflag [#allocation6], %s195_s8  ;;  %s209_s5 = scalar_lea.vmem [#allocation5], %s418_s12 }
  0x39   : > { %653 = dma.done.wait (%p763_p6), %s206_s28, 256  }
  0x3a   : > { %655 = vsyncadd (%p763_p6), %s206_s28, 4294967040  ;;  %s233_s4 = sand.u32 1, %s667_s10   ;;  %s421_s17 = sshll.u32 %s683_s14, 4  ;;  %v697_v0 = vmov 0.0   ;;  %v249_v1 = vld [vmem:[%s199_s23] sm:$0xff]  ;;  %v250_v2 = vld [vmem:[%s199_s23 + $0x8] sm:$0xff] }
  0x3b   : > { %s420_s18 = sshll.u32 %s233_s4, 3  ;;  %s259_s20 = sadd.s32 16, %s421_s17  ;;  %v251_v3 = vld [vmem:[%s209_s5] sm:$0xff]  ;;  %v252_v4 = vld [vmem:[%s209_s5 + $0x8] sm:$0xff] }
  0x3c   : > { %s842_s27 = scalar_lea.vmem [#allocation7], %s420_s18  ;;  %v253_v5 = vsub.f32 %v249_v1, %v251_v3  ;;  %v254_v6 = vsub.f32 %v250_v2, %v252_v4  ;;  %p422_p6 = scmp.gt.s32.totalorder %s259_s20, 16 }
  0x3d   : > { %248 = vst [vmem:[%s842_s27] sm:$0xff] %v697_v0 }
  0x3e   : > { %v255_v7 = vmul.f32 %v253_v5, %v253_v5  ;;  %v256_v8 = vmul.f32 %v254_v6, %v254_v6  ;;  %264 = sbr.rel (%p422_p6) target bundleno = 72 (0x48), region = 44 }
  0x43   : > { %v266_v10 = vadd.f32 %v256_v8, %v255_v7 }
  0x44   : > { %v265_v9 = vld [vmem:[%s842_s27] sm:$0xff] }
  0x45   : > { %v267_v11 = vadd.f32 %v266_v10, %v265_v9 }
  0x47   : > { %268 = vst [vmem:[%s842_s27] sm:$0xff] %v267_v11 }
  0x48 PF: > { %p423_p2 = scmp.le.s32.totalorder %s259_s20, 16 }
  0x4a   : > { %271 = sbr.rel (%p423_p2) target bundleno = 94 (0x5e), region = 48 }
  0x4f   : > { %v272_v12 = vlaneseq  ;;  %v275_v13 = vstv %s421_s17  ;;  %v286_v20 = vld [vmem:[%s842_s27] sm:$0xff] }
  0x51   : > { %v273_v14 = vshrl.u32 %v272_v12, 7 }
  0x53   : > { %v274_v15 = vadd.s32 8, %v273_v14  ;;  %v276_v16 = vadd.s32 %v275_v13, %v273_v14 }
  0x55   : > { %v277_v17 = vadd.s32 %v275_v13, %v274_v15  ;;  %vm278_vm0 = vcmp.lt.s32.totalorder %v276_v16, 16 }
  0x56   : > { %v284_v18 = vsel %vm278_vm0, %v255_v7, 0.0 }
  0x57   : > { %vm279_vm1 = vcmp.lt.s32.totalorder %v277_v17, 16 }
  0x58   : > { %v285_v19 = vsel %vm279_vm1, %v256_v8, 0.0 }
  0x59   : > { %v287_v21 = vadd.f32 %v285_v19, %v284_v18 }
  0x5b   : > { %v288_v22 = vadd.f32 %v287_v21, %v286_v20 }
  0x5d   : > { %289 = vst [vmem:[%s842_s27] sm:$0xff] %v288_v22 }
  0x5e PF: > { %s425_s21 = sshll.u32 %s683_s14, 3  ;;  %s303_s3 = sshll.u32 %s842_s27, 4  ;;  %s304_s3 = int_to_ptr.vmem [resolvable:$true] %s303_s3 }
  0x5f   : > { %s301_s29 = scalar_lea.hbm %s896_s2, %s425_s21  ;;  %s291_s8 = scalar_lea.sflag [#allocation4], %s233_s4 }
  0x60   : > { %s305_s7 = sshll.u32 %s301_s29, 4  ;;  %s604_s14 = scalar_lea.hbm %s896_s2, 16  ;;  %s306_s7 = int_to_ptr.hbm [resolvable:$true] %s305_s7 }
  0x61   : > { %s598_s12 = sshra.s32 %s306_s7, 4  ;;  %s599_s12 = int_to_ptr.hbm [resolvable:$true] %s598_s12 }
  0x62   : > { %s600_s22 = scalar_lea.hbm %s599_s12, 8  ;;  %p605_p1 = scmp.lt.s32.totalorder %s599_s12, %s896_s2 }
  0x63   : > { %p601_p8 = scmp.ne.s32.totalorder %s599_s12, %s600_s22  ;;  %p606_p7 = scmp.lt.s32.totalorder %s604_s14, %s600_s22 }
  0x65   : > { %p602_p4 = pnand %p601_p8, %p777_p12  ;;  %p607_p9 = por %p606_p7, %p605_p1 }
  0x67   : > { %p603_p11 = pneg %p602_p4 }
  0x69   : > { %p608_p10 = pnand %p607_p9, %p603_p11 }
  0x6b   : > { %611 = shalt.err (!%p608_p10)
}
  0x6c   : > { %434 = dma.vmem_to_hbm [thread:$0]  (%p777_p12), %s304_s3, 128, %s306_s7, %s291_s8  }
  0x6d PF: > { %s317_s4 = sand.u32 1, %s663_s9   ;;  %p444_p3 = pnand %p410_p13, %p782_p0 }
  0x6e   : > { %s318_s18 = scalar_lea.sflag [#allocation4], %s317_s4 }
  0x6f   : > { %p445_p5 = pneg %p444_p3 }
  0x71   : > { %657 = dma.done.wait (%p445_p5), %s318_s18, 128  }
  0x72   : > { %659 = vsyncadd (%p445_p5), %s318_s18, 4294967168  ;;  %s21_s16 = sadd.s32 1, %s691_s16   ;;  %s903_s9 = smov %s667_s10 }
  0x73   : > { %p18_p6 = scmp.ge.s32.totalorder %s21_s16, 4   ;;  %s904_s10 = smov %s671_s11 }
  0x74   : > { %s905_s11 = smov %s771_s24  ;;  %s906_s12 = smov %s679_s13 }
  0x75   : > { %s884_s13 = smov 0   ;;  %s907_s14 = smov %s687_s15 }
  0x76   : > { %s908_s15 = smov %s910_s19  ;;  %20 = sbr.rel (!%p18_p6) target bundleno = 9 (0x9), region = 98 }
  0x7b   :  { %324 = vsyncpa [#allocation3], 1 }
  0x7c   :  { %326 = vsyncpa [#allocation3 + $0x1], 1 }
  0x7d   :  { %327 = vsyncpa [#allocation6], 1 }
  0x7e   :  { %329 = vsyncpa [#allocation6 + $0x1], 1 }
  0x7f   :  { %330 = vsyncpa [#allocation4], 1 }
  0x80   :  { %332 = vsyncpa [#allocation4 + $0x1], 1 }

</bundles_post_ra>
